<compile_context>
chip_gen: v5e
topology: v5e:2x2
jax: 0.10.0
libtpu: 0.0.40
codegen_flags: <defaults>
</compile_context>

<pallas_src>
import functools

import jax
import jax.numpy as jnp
from jax import lax
from jax.experimental import pallas as pl
from jax.experimental.pallas import tpu as pltpu


# ---------------------------------------------------------------------------
# Helpers.
# ---------------------------------------------------------------------------
def _default_vmem_limit():
    """Generation-dependent VMEM budget: ~3/4 of physical (96 MiB v5e/v6e, 48 MiB v7x)."""
    try:
        cap = pltpu.get_tpu_info().vmem_capacity_bytes
    except Exception:
        cap = 64 * 1024 * 1024
    return int(min(max(cap * 3 // 4, 32 * 1024 * 1024), 120 * 1024 * 1024))


def _tile(n, target, multiple=1):
    """Largest t <= max(target, multiple) with n % t == 0 and t % multiple == 0."""
    cap = min(n, max(target, multiple))
    best = None
    t = multiple
    while t <= cap:
        if n % t == 0:
            best = t
        t += multiple
    return best if best is not None else n


# ---------------------------------------------------------------------------
# Kernel 1: fused Q/K/V projections + RoPE + head-major relayout.
# Weights are pre-transposed to (H_in, H_out) so the kernel computes x @ W
# (== torch's x @ weight.T).  Outputs are (B, nh, S, hd); RoPE is applied once
# here (q-side cos/sin carry the softmax scale), so the flash kernel is RoPE-free.
# ---------------------------------------------------------------------------
def _qkv_rope_kernel(x_ref, wq_ref, wk_ref, wv_ref,
                     cq_ref, sq_ref, ck_ref, sk_ref,
                     q_ref, k_ref, v_ref, *, head_dim):
    half = head_dim // 2
    heads_per_block = q_ref.shape[1]

    x = x_ref[0]                                                         # (ts, H)
    yq = jnp.dot(x, wq_ref[...], preferred_element_type=jnp.float32)    # (ts, tn) f32
    yk = jnp.dot(x, wk_ref[...], preferred_element_type=jnp.float32)
    yv = jnp.dot(x, wv_ref[...], preferred_element_type=jnp.float32)

    cq, sq = cq_ref[...], sq_ref[...]                                    # (ts, hd) f32, scale folded
    ck, sk = ck_ref[...], sk_ref[...]                                    # (ts, hd) f32

    # Per-head head-major relayout (lane-aligned slab writes) + RoPE.
    # rotate_half is an XLU lane roll; the sign is baked into the sin caches.
    for h in range(heads_per_block):                                     # static unroll (small)
        sl = slice(h * head_dim, (h + 1) * head_dim)
        qh = yq[:, sl]                                                   # (ts, hd) f32
        kh = yk[:, sl]
        q_ref[0, h] = (qh * cq + pltpu.roll(qh, shift=half, axis=1) * sq).astype(q_ref.dtype)
        k_ref[0, h] = (kh * ck + pltpu.roll(kh, shift=half, axis=1) * sk).astype(k_ref.dtype)
        v_ref[0, h] = yv[:, sl].astype(v_ref.dtype)


def _qkv_rope_projection(x, wq_t, wk_t, wv_t, cos_q, sin_q, cos_k, sin_k,
                         *, num_heads, ts, tn, vmem_limit):
    B, S, H = x.shape
    hd = H // num_heads
    hpb = tn // hd                                        # heads per weight column block
    out = jax.ShapeDtypeStruct((B, num_heads, S, hd), x.dtype)
    kernel = functools.partial(_qkv_rope_kernel, head_dim=hd)
    head_major = pl.BlockSpec((1, hpb, ts, hd), lambda b, n, s: (b, n, s, 0))
    rope_spec = pl.BlockSpec((ts, hd), lambda b, n, s: (s, 0))
    return pl.pallas_call(
        kernel,
        out_shape=(out, out, out),
        grid=(B, H // tn, S // ts),                       # s innermost: weight block stays resident
        in_specs=[
            pl.BlockSpec((1, ts, H), lambda b, n, s: (b, s, 0)),   # hidden_states tile
            pl.BlockSpec((H, tn), lambda b, n, s: (0, n)),         # Wq^T column block
            pl.BlockSpec((H, tn), lambda b, n, s: (0, n)),         # Wk^T column block
            pl.BlockSpec((H, tn), lambda b, n, s: (0, n)),         # Wv^T column block
            rope_spec, rope_spec,                                  # cos*scale, sin*sign*scale (q)
            rope_spec, rope_spec,                                  # cos, sin*sign (k)
        ],
        out_specs=(head_major, head_major, head_major),
        compiler_params=pltpu.CompilerParams(
            dimension_semantics=("parallel", "parallel", "parallel"),
            vmem_limit_bytes=vmem_limit,
        ),
    )(x, wq_t, wk_t, wv_t, cos_q, sin_q, cos_k, sin_k)


# ---------------------------------------------------------------------------
# Kernel 2: flash-style attention (online softmax over KV tiles).
# q/k/v arrive head-major (B, nh, S, hd), already RoPE'd; q already carries the
# softmax scale.  Grid: (B, head_groups, q_tiles, kv_tiles), kv axis "arbitrary".
# Output is written head-merged (B, S, H) so the Wo GEMM consumes it directly.
# ---------------------------------------------------------------------------
def _flash_attn_kernel(q_ref, k_ref, v_ref, o_ref, m_ref, l_ref, acc_ref,
                       *, exp_in_bf16, approx_recip):
    kv = pl.program_id(3)

    @pl.when(kv == 0)
    def _init():
        m_ref[...] = jnp.full(m_ref.shape, -jnp.inf, jnp.float32)
        l_ref[...] = jnp.zeros(l_ref.shape, jnp.float32)
        acc_ref[...] = jnp.zeros(acc_ref.shape, jnp.float32)

    q = q_ref[0]                                                  # (hb, tq, hd)
    k = k_ref[0]                                                  # (hb, tk, hd)
    v = v_ref[0]

    # s[h, i, j] = sum_d q[h, i, d] * k[h, j, d] — batched over heads, no materialized k.T.
    s = lax.dot_general(q, k, dimension_numbers=(((2,), (2,)), ((0,), (0,))),
                        preferred_element_type=jnp.float32)       # (hb, tq, tk) f32

    # TODO(synk): when causal/attention_mask support lands, skip whole upper-triangle KV
    #             tiles with pl.when instead of masking scores.

    m_prev = m_ref[...]
    m_new = jnp.maximum(m_prev, jnp.max(s, axis=-1, keepdims=True))
    alpha = jnp.exp(m_prev - m_new)
    if exp_in_bf16:                                               # EUP relief (v6e/v7x only)
        p = jnp.exp((s - m_new).astype(jnp.bfloat16))
    else:
        p = jnp.exp(s - m_new)
    l_ref[...] = alpha * l_ref[...] + jnp.sum(p.astype(jnp.float32), axis=-1, keepdims=True)
    pv = lax.dot_general(p.astype(v.dtype), v,                    # probs in hidden dtype (torch)
                         dimension_numbers=(((2,), (1,)), ((0,), (0,))),
                         preferred_element_type=jnp.float32)      # (hb, tq, hd)
    acc_ref[...] = alpha * acc_ref[...] + pv
    m_ref[...] = m_new

    @pl.when(kv == pl.num_programs(3) - 1)
    def _finalize():
        hb, _, hd = acc_ref.shape
        inv_l = pl.reciprocal(l_ref[...], approx=approx_recip)    # exact on f32 path
        attn = acc_ref[...] * inv_l                               # (hb, tq, hd) f32
        # Merge heads into the lane-dense (tq, hb*hd) output slab with aligned slab stores.
        for h in range(hb):                                       # static unroll (small)
            o_ref[0, :, h * hd:(h + 1) * hd] = attn[h].astype(o_ref.dtype)


def _flash_attention(q_h, k_h, v_h, *, tq, tk, head_block, out_dtype, exp_in_bf16, vmem_limit):
    B, nh, S, hd = q_h.shape
    hb = head_block
    H = nh * hd
    kernel = functools.partial(
        _flash_attn_kernel,
        exp_in_bf16=exp_in_bf16,
        approx_recip=(out_dtype == jnp.bfloat16),
    )
    return pl.pallas_call(
        kernel,
        out_shape=jax.ShapeDtypeStruct((B, S, H), out_dtype),
        grid=(B, nh // hb, S // tq, S // tk),
        in_specs=[
            pl.BlockSpec((1, hb, tq, hd), lambda b, h, qi, kv: (b, h, qi, 0)),   # q (resident over kv)
            pl.BlockSpec((1, hb, tk, hd), lambda b, h, qi, kv: (b, h, kv, 0)),   # k
            pl.BlockSpec((1, hb, tk, hd), lambda b, h, qi, kv: (b, h, kv, 0)),   # v
        ],
        out_specs=pl.BlockSpec((1, tq, hb * hd), lambda b, h, qi, kv: (b, qi, h)),
        scratch_shapes=[
            pltpu.VMEM((hb, tq, 1), jnp.float32),    # running max m
            pltpu.VMEM((hb, tq, 1), jnp.float32),    # running denom l
            pltpu.VMEM((hb, tq, hd), jnp.float32),   # running numerator acc
        ],
        compiler_params=pltpu.CompilerParams(
            dimension_semantics=("parallel", "parallel", "parallel", "arbitrary"),
            vmem_limit_bytes=vmem_limit,
        ),
    )(q_h, k_h, v_h)


# ---------------------------------------------------------------------------
# Kernel 3: output projection (plain tiled GEMM, full-H contraction in one dot).
# ---------------------------------------------------------------------------
def _linear_kernel(x_ref, w_ref, o_ref):
    o_ref[0] = jnp.dot(x_ref[0], w_ref[...],
                       preferred_element_type=jnp.float32).astype(o_ref.dtype)


def _linear(x, w_t, *, ts, tn, vmem_limit):
    B, S, H = x.shape
    N = w_t.shape[1]
    return pl.pallas_call(
        _linear_kernel,
        out_shape=jax.ShapeDtypeStruct((B, S, N), x.dtype),
        grid=(B, N // tn, S // ts),
        in_specs=[
            pl.BlockSpec((1, ts, H), lambda b, n, s: (b, s, 0)),
            pl.BlockSpec((H, tn), lambda b, n, s: (0, n)),
        ],
        out_specs=pl.BlockSpec((1, ts, tn), lambda b, n, s: (b, s, n)),
        compiler_params=pltpu.CompilerParams(
            dimension_semantics=("parallel", "parallel", "parallel"),
            vmem_limit_bytes=vmem_limit,
        ),
    )(x, w_t)


# ---------------------------------------------------------------------------
# Public wrapper.
# ---------------------------------------------------------------------------
def llama_attention(x, wq_t, wk_t, wv_t, wo_t, cos, sin, *, num_heads,
                    q_block=None, kv_block=None, head_block=None,
                    proj_seq_block=None, proj_out_block=None, out_proj_block=None,
                    exp_in_bf16=False, vmem_limit_bytes=None):
    """x: (B, S, H).  w*_t: (H, H) pre-transposed weights (x @ w_t == x @ W.T in torch).
    cos/sin: (S, head_dim) rotary caches (position_ids = arange(S))."""
    B, S, H = x.shape
    assert H % num_heads == 0
    hd = H // num_heads
    assert hd % 2 == 0
    scale = hd ** -0.5

    vmem_limit = vmem_limit_bytes or _default_vmem_limit()
    big_budget = vmem_limit >= (80 << 20) and x.dtype == jnp.bfloat16

    tq = q_block or _tile(S, 256)
    tk = kv_block or _tile(S, 256)
    ts = proj_seq_block or _tile(S, 256)
    tn = proj_out_block or _tile(H, 1024 if big_budget else 512, multiple=hd)
    tn_o = out_proj_block or _tile(H, 1024 if big_budget else 512)
    if head_block is None:
        hb = _tile(num_heads, 8) if hd % 128 == 0 else num_heads   # keep output lane-dense
    else:
        hb = head_block

    assert S % tq == 0 and S % tk == 0 and S % ts == 0
    assert num_heads % hb == 0
    assert H % tn == 0 and tn % hd == 0 and H % tn_o == 0

    # Bake the rotate_half sign into a signed sin cache and fold the softmax scale into
    # the q-side caches (so no per-score scaling happens in the flash inner loop).
    half = hd // 2
    sign = jnp.concatenate([-jnp.ones((half,), jnp.float32), jnp.ones((half,), jnp.float32)])
    cos32 = cos.astype(jnp.float32)
    sin_signed = sin.astype(jnp.float32) * sign[None, :]
    cos_q, sin_q = cos32 * scale, sin_signed * scale
    cos_k, sin_k = cos32, sin_signed

    # 1) Fused Q/K/V projections + RoPE + head-major relayout (no XLA transpose).
    q_h, k_h, v_h = _qkv_rope_projection(x, wq_t, wk_t, wv_t, cos_q, sin_q, cos_k, sin_k,
                                         num_heads=num_heads, ts=ts, tn=tn,
                                         vmem_limit=vmem_limit)

    # 2) Flash attention (online softmax over KV tiles), head-merged (B, S, H) output.
    attn = _flash_attention(q_h, k_h, v_h, tq=tq, tk=tk, head_block=hb,
                            out_dtype=x.dtype, exp_in_bf16=exp_in_bf16,
                            vmem_limit=vmem_limit)

    # 3) Output projection as its own tiled GEMM (Wo never resident in the flash kernel).
    return _linear(attn, wo_t, ts=ts, tn=tn_o, vmem_limit=vmem_limit)


# ---------------------------------------------------------------------------
# Rotary cache + pure-JAX reference (mirrors the PyTorch forward, eval, no mask).
# ---------------------------------------------------------------------------
def rope_cache(seq_len, head_dim, base=10000.0, dtype=jnp.float32):
    inv_freq = 1.0 / (base ** (jnp.arange(0, head_dim, 2, dtype=jnp.float32) / head_dim))
    t = jnp.arange(seq_len, dtype=jnp.float32)
    freqs = jnp.einsum('i,j->ij', t, inv_freq)           # (S, hd/2)
    emb = jnp.concatenate([freqs, freqs], axis=-1)       # (S, hd)
    return jnp.cos(emb).astype(dtype), jnp.sin(emb).astype(dtype)


def reference_attention(x, wq_t, wk_t, wv_t, wo_t, cos, sin, *, num_heads):
    B, S, H = x.shape
    hd = H // num_heads
    scale = hd ** -0.5

    def proj(w_t):
        y = jnp.einsum('bsh,hd->bsd', x, w_t)
        return y.reshape(B, S, num_heads, hd).transpose(0, 2, 1, 3)   # (B, nh, S, hd)

    q, k, v = proj(wq_t), proj(wk_t), proj(wv_t)

    def rot_half(t):
        return jnp.concatenate([-t[..., hd // 2:], t[..., :hd // 2]], axis=-1)

    c = cos[None, None, :, :]
    s = sin[None, None, :, :]
    q = q * c + rot_half(q) * s
    k = k * c + rot_half(k) * s

    scores = jnp.einsum('bhqd,bhkd->bhqk', q, k) * scale
    probs = jax.nn.softmax(scores.astype(jnp.float32), axis=-1).astype(x.dtype)
    attn = jnp.einsum('bhqk,bhkd->bhqd', probs, v)
    attn = attn.transpose(0, 2, 1, 3).reshape(B, S, H)
    return jnp.einsum('bsh,hd->bsd', attn, wo_t)


if __name__ == "__main__":
    root = jax.random.PRNGKey(0)
    key1, key2 = jax.random.split(root)

    def make_inputs(key, B, S, H):
        kx, kq, kk, kv, ko = jax.random.split(key, 5)
        x = jax.random.normal(kx, (B, S, H), dtype=jnp.float32)
        # PyTorch nn.Linear weight has shape (out, in); pass transposed (in, out).
        wq = jax.random.normal(kq, (H, H), dtype=jnp.float32) * 0.05
        wk = jax.random.normal(kk, (H, H), dtype=jnp.float32) * 0.05
        wv = jax.random.normal(kv, (H, H), dtype=jnp.float32) * 0.05
        wo = jax.random.normal(ko, (H, H), dtype=jnp.float32) * 0.05
        return x, wq.T, wk.T, wv.T, wo.T

    # --- Case 1: tiny config — multi-batch, multiple q/kv tiles (online softmax path),
    #     multiple heads per projection column block.  hidden=32, 4 heads, head_dim=8.
    B, S, H, nh = 2, 16, 32, 4
    hd = H // nh
    x, wq_t, wk_t, wv_t, wo_t = make_inputs(key1, B, S, H)
    cos, sin = rope_cache(S, hd)
    tiles = dict(q_block=8, kv_block=8, head_block=nh, proj_seq_block=8,
                 proj_out_block=H, out_proj_block=H)

    out = llama_attention(x, wq_t, wk_t, wv_t, wo_t, cos, sin, num_heads=nh, **tiles)
    out = jax.block_until_ready(out)
    ref = reference_attention(x, wq_t, wk_t, wv_t, wo_t, cos, sin, num_heads=nh)
    assert out.shape == (B, S, H)
    assert jnp.allclose(out, ref, atol=2e-3, rtol=2e-3), "case-1 f32 mismatch vs JAX reference"

    # bf16 run (production dtype: bf16 MXU operands, f32 accumulation).
    bf = lambda t: t.astype(jnp.bfloat16)
    out_bf = llama_attention(bf(x), bf(wq_t), bf(wk_t), bf(wv_t), bf(wo_t), cos, sin,
                             num_heads=nh, **tiles)
    out_bf = jax.block_until_ready(out_bf)
    ref_bf = reference_attention(bf(x).astype(jnp.float32), bf(wq_t).astype(jnp.float32),
                                 bf(wk_t).astype(jnp.float32), bf(wv_t).astype(jnp.float32),
                                 bf(wo_t).astype(jnp.float32), cos, sin, num_heads=nh)
    assert jnp.allclose(out_bf.astype(jnp.float32), ref_bf, atol=5e-2, rtol=5e-2), \
        "case-1 bf16 mismatch"

    # --- Case 2: head_dim=128 config — exercises the head-group grid axis (hb < nh) and
    #     multiple weight column blocks in the projection kernels.  hidden=256, 2 heads.
    B2, S2, H2, nh2 = 1, 16, 256, 2
    hd2 = H2 // nh2
    x2, wq2, wk2, wv2, wo2 = make_inputs(key2, B2, S2, H2)
    cos2, sin2 = rope_cache(S2, hd2)
    tiles2 = dict(q_block=8, kv_block=8, head_block=1, proj_seq_block=8,
                  proj_out_block=128, out_proj_block=128)
    out2 = llama_attention(x2, wq2, wk2, wv2, wo2, cos2, sin2, num_heads=nh2, **tiles2)
    out2 = jax.block_until_ready(out2)
    ref2 = reference_attention(x2, wq2, wk2, wv2, wo2, cos2, sin2, num_heads=nh2)
    assert out2.shape == (B2, S2, H2)
    assert jnp.allclose(out2, ref2, atol=5e-3, rtol=5e-3), "case-2 f32 mismatch vs JAX reference"

    print("KERNEL_OK")
</pallas_src>

<mosaic_0001>
module attributes {stable_mosaic.version = 11 : i64} {
  func.func @_qkv_rope_kernel(%arg0: i32, %arg1: i32, %arg2: i32, %arg3: memref<1x8x32xf32, #tpu.memory_space<vmem>>, %arg4: memref<32x32xf32, #tpu.memory_space<vmem>>, %arg5: memref<32x32xf32, #tpu.memory_space<vmem>>, %arg6: memref<32x32xf32, #tpu.memory_space<vmem>>, %arg7: memref<8x8xf32, #tpu.memory_space<vmem>>, %arg8: memref<8x8xf32, #tpu.memory_space<vmem>>, %arg9: memref<8x8xf32, #tpu.memory_space<vmem>>, %arg10: memref<8x8xf32, #tpu.memory_space<vmem>>, %arg11: memref<1x4x8x8xf32, #tpu.memory_space<vmem>>, %arg12: memref<1x4x8x8xf32, #tpu.memory_space<vmem>>, %arg13: memref<1x4x8x8xf32, #tpu.memory_space<vmem>>) attributes {dimension_semantics = [#tpu.dimension_semantics<parallel>, #tpu.dimension_semantics<parallel>, #tpu.dimension_semantics<parallel>], iteration_bounds = array<i64: 2, 1, 2>, scalar_prefetch = 0 : i64, scratch_operands = 0 : i64, tpu.core_type = #tpu.core_type<tc>, window_params = [{transform_indices = @transform_0, window_bounds = array<i64: 1, 8, 32>}, {transform_indices = @transform_1, window_bounds = array<i64: 32, 32>}, {transform_indices = @transform_2, window_bounds = array<i64: 32, 32>}, {transform_indices = @transform_3, window_bounds = array<i64: 32, 32>}, {transform_indices = @transform_4, window_bounds = array<i64: 8, 8>}, {transform_indices = @transform_5, window_bounds = array<i64: 8, 8>}, {transform_indices = @transform_6, window_bounds = array<i64: 8, 8>}, {transform_indices = @transform_7, window_bounds = array<i64: 8, 8>}, {transform_indices = @transform_8, window_bounds = array<i64: 1, 4, 8, 8>}, {transform_indices = @transform_9, window_bounds = array<i64: 1, 4, 8, 8>}, {transform_indices = @transform_10, window_bounds = array<i64: 1, 4, 8, 8>}]} {
    %c0 = arith.constant 0 : index
    %c0_0 = arith.constant 0 : index
    %c0_1 = arith.constant 0 : index
    %0 = vector.load %arg3[%c0, %c0_0, %c0_1] : memref<1x8x32xf32, #tpu.memory_space<vmem>>, vector<1x8x32xf32>
    %1 = vector.shape_cast %0 : vector<1x8x32xf32> to vector<8x32xf32>
    %c0_2 = arith.constant 0 : index
    %c0_3 = arith.constant 0 : index
    %2 = vector.load %arg4[%c0_2, %c0_3] : memref<32x32xf32, #tpu.memory_space<vmem>>, vector<32x32xf32>
    %cst = arith.constant dense<0.000000e+00> : vector<8x32xf32>
    %3 = tpu.matmul %1, %2, %cst {dimension_numbers = #tpu.dot_dimension_numbers<[1], [0], [0], [1], [0, 0, 1, 1], [], []>} : vector<8x32xf32>, vector<32x32xf32>, vector<8x32xf32> -> vector<8x32xf32>
    %c0_4 = arith.constant 0 : index
    %c0_5 = arith.constant 0 : index
    %4 = vector.load %arg5[%c0_4, %c0_5] : memref<32x32xf32, #tpu.memory_space<vmem>>, vector<32x32xf32>
    %cst_6 = arith.constant dense<0.000000e+00> : vector<8x32xf32>
    %5 = tpu.matmul %1, %4, %cst_6 {dimension_numbers = #tpu.dot_dimension_numbers<[1], [0], [0], [1], [0, 0, 1, 1], [], []>} : vector<8x32xf32>, vector<32x32xf32>, vector<8x32xf32> -> vector<8x32xf32>
    %c0_7 = arith.constant 0 : index
    %c0_8 = arith.constant 0 : index
    %6 = vector.load %arg6[%c0_7, %c0_8] : memref<32x32xf32, #tpu.memory_space<vmem>>, vector<32x32xf32>
    %cst_9 = arith.constant dense<0.000000e+00> : vector<8x32xf32>
    %7 = tpu.matmul %1, %6, %cst_9 {dimension_numbers = #tpu.dot_dimension_numbers<[1], [0], [0], [1], [0, 0, 1, 1], [], []>} : vector<8x32xf32>, vector<32x32xf32>, vector<8x32xf32> -> vector<8x32xf32>
    %c0_10 = arith.constant 0 : index
    %c0_11 = arith.constant 0 : index
    %8 = vector.load %arg7[%c0_10, %c0_11] : memref<8x8xf32, #tpu.memory_space<vmem>>, vector<8x8xf32>
    %c0_12 = arith.constant 0 : index
    %c0_13 = arith.constant 0 : index
    %9 = vector.load %arg8[%c0_12, %c0_13] : memref<8x8xf32, #tpu.memory_space<vmem>>, vector<8x8xf32>
    %c0_14 = arith.constant 0 : index
    %c0_15 = arith.constant 0 : index
    %10 = vector.load %arg9[%c0_14, %c0_15] : memref<8x8xf32, #tpu.memory_space<vmem>>, vector<8x8xf32>
    %c0_16 = arith.constant 0 : index
    %c0_17 = arith.constant 0 : index
    %11 = vector.load %arg10[%c0_16, %c0_17] : memref<8x8xf32, #tpu.memory_space<vmem>>, vector<8x8xf32>
    %12 = vector.extract_strided_slice %3 {offsets = [0, 0], sizes = [8, 8], strides = [1, 1]} : vector<8x32xf32> to vector<8x8xf32>
    %13 = vector.extract_strided_slice %5 {offsets = [0, 0], sizes = [8, 8], strides = [1, 1]} : vector<8x32xf32> to vector<8x8xf32>
    %14 = arith.mulf %12, %8 : vector<8x8xf32>
    %c4_i32 = arith.constant 4 : i32
    %15 = tpu.dynamic_rotate %12 by %c4_i32 dim 1 : vector<8x8xf32>, i32 -> vector<8x8xf32>
    %16 = arith.mulf %15, %9 : vector<8x8xf32>
    %17 = arith.addf %14, %16 : vector<8x8xf32>
    %c0_18 = arith.constant 0 : index
    %c0_19 = arith.constant 0 : index
    %c0_20 = arith.constant 0 : index
    %c0_21 = arith.constant 0 : index
    %18 = vector.load %arg11[%c0_18, %c0_19, %c0_20, %c0_21] : memref<1x4x8x8xf32, #tpu.memory_space<vmem>>, vector<1x1x8x8xf32>
    %19 = vector.shape_cast %18 : vector<1x1x8x8xf32> to vector<8x8xf32>
    %20 = vector.shape_cast %17 : vector<8x8xf32> to vector<1x1x8x8xf32>
    tpu.vector_store %arg11[%c0_18, %c0_19, %c0_20, %c0_21], %20 {strides = array<i32>} : memref<1x4x8x8xf32, #tpu.memory_space<vmem>>, vector<1x1x8x8xf32>,
    %21 = arith.mulf %13, %10 : vector<8x8xf32>
    %c4_i32_22 = arith.constant 4 : i32
    %22 = tpu.dynamic_rotate %13 by %c4_i32_22 dim 1 : vector<8x8xf32>, i32 -> vector<8x8xf32>
    %23 = arith.mulf %22, %11 : vector<8x8xf32>
    %24 = arith.addf %21, %23 : vector<8x8xf32>
    %c0_23 = arith.constant 0 : index
    %c0_24 = arith.constant 0 : index
    %c0_25 = arith.constant 0 : index
    %c0_26 = arith.constant 0 : index
    %25 = vector.load %arg12[%c0_23, %c0_24, %c0_25, %c0_26] : memref<1x4x8x8xf32, #tpu.memory_space<vmem>>, vector<1x1x8x8xf32>
    %26 = vector.shape_cast %25 : vector<1x1x8x8xf32> to vector<8x8xf32>
    %27 = vector.shape_cast %24 : vector<8x8xf32> to vector<1x1x8x8xf32>
    tpu.vector_store %arg12[%c0_23, %c0_24, %c0_25, %c0_26], %27 {strides = array<i32>} : memref<1x4x8x8xf32, #tpu.memory_space<vmem>>, vector<1x1x8x8xf32>,
    %28 = vector.extract_strided_slice %7 {offsets = [0, 0], sizes = [8, 8], strides = [1, 1]} : vector<8x32xf32> to vector<8x8xf32>
    %c0_27 = arith.constant 0 : index
    %c0_28 = arith.constant 0 : index
    %c0_29 = arith.constant 0 : index
    %c0_30 = arith.constant 0 : index
    %29 = vector.load %arg13[%c0_27, %c0_28, %c0_29, %c0_30] : memref<1x4x8x8xf32, #tpu.memory_space<vmem>>, vector<1x1x8x8xf32>
    %30 = vector.shape_cast %29 : vector<1x1x8x8xf32> to vector<8x8xf32>
    %31 = vector.shape_cast %28 : vector<8x8xf32> to vector<1x1x8x8xf32>
    tpu.vector_store %arg13[%c0_27, %c0_28, %c0_29, %c0_30], %31 {strides = array<i32>} : memref<1x4x8x8xf32, #tpu.memory_space<vmem>>, vector<1x1x8x8xf32>,
    %32 = vector.extract_strided_slice %3 {offsets = [0, 8], sizes = [8, 8], strides = [1, 1]} : vector<8x32xf32> to vector<8x8xf32>
    %33 = vector.extract_strided_slice %5 {offsets = [0, 8], sizes = [8, 8], strides = [1, 1]} : vector<8x32xf32> to vector<8x8xf32>
    %34 = arith.mulf %32, %8 : vector<8x8xf32>
    %c4_i32_31 = arith.constant 4 : i32
    %35 = tpu.dynamic_rotate %32 by %c4_i32_31 dim 1 : vector<8x8xf32>, i32 -> vector<8x8xf32>
    %36 = arith.mulf %35, %9 : vector<8x8xf32>
    %37 = arith.addf %34, %36 : vector<8x8xf32>
    %c0_32 = arith.constant 0 : index
    %c1 = arith.constant 1 : index
    %c0_33 = arith.constant 0 : index
    %c0_34 = arith.constant 0 : index
    %38 = vector.load %arg11[%c0_32, %c1, %c0_33, %c0_34] : memref<1x4x8x8xf32, #tpu.memory_space<vmem>>, vector<1x1x8x8xf32>
    %39 = vector.shape_cast %38 : vector<1x1x8x8xf32> to vector<8x8xf32>
    %40 = vector.shape_cast %37 : vector<8x8xf32> to vector<1x1x8x8xf32>
    tpu.vector_store %arg11[%c0_32, %c1, %c0_33, %c0_34], %40 {strides = array<i32>} : memref<1x4x8x8xf32, #tpu.memory_space<vmem>>, vector<1x1x8x8xf32>,
    %41 = arith.mulf %33, %10 : vector<8x8xf32>
    %c4_i32_35 = arith.constant 4 : i32
    %42 = tpu.dynamic_rotate %33 by %c4_i32_35 dim 1 : vector<8x8xf32>, i32 -> vector<8x8xf32>
    %43 = arith.mulf %42, %11 : vector<8x8xf32>
    %44 = arith.addf %41, %43 : vector<8x8xf32>
    %c0_36 = arith.constant 0 : index
    %c1_37 = arith.constant 1 : index
    %c0_38 = arith.constant 0 : index
    %c0_39 = arith.constant 0 : index
    %45 = vector.load %arg12[%c0_36, %c1_37, %c0_38, %c0_39] : memref<1x4x8x8xf32, #tpu.memory_space<vmem>>, vector<1x1x8x8xf32>
    %46 = vector.shape_cast %45 : vector<1x1x8x8xf32> to vector<8x8xf32>
    %47 = vector.shape_cast %44 : vector<8x8xf32> to vector<1x1x8x8xf32>
    tpu.vector_store %arg12[%c0_36, %c1_37, %c0_38, %c0_39], %47 {strides = array<i32>} : memref<1x4x8x8xf32, #tpu.memory_space<vmem>>, vector<1x1x8x8xf32>,
    %48 = vector.extract_strided_slice %7 {offsets = [0, 8], sizes = [8, 8], strides = [1, 1]} : vector<8x32xf32> to vector<8x8xf32>
    %c0_40 = arith.constant 0 : index
    %c1_41 = arith.constant 1 : index
    %c0_42 = arith.constant 0 : index
    %c0_43 = arith.constant 0 : index
    %49 = vector.load %arg13[%c0_40, %c1_41, %c0_42, %c0_43] : memref<1x4x8x8xf32, #tpu.memory_space<vmem>>, vector<1x1x8x8xf32>
    %50 = vector.shape_cast %49 : vector<1x1x8x8xf32> to vector<8x8xf32>
    %51 = vector.shape_cast %48 : vector<8x8xf32> to vector<1x1x8x8xf32>
    tpu.vector_store %arg13[%c0_40, %c1_41, %c0_42, %c0_43], %51 {strides = array<i32>} : memref<1x4x8x8xf32, #tpu.memory_space<vmem>>, vector<1x1x8x8xf32>,
    %52 = vector.extract_strided_slice %3 {offsets = [0, 16], sizes = [8, 8], strides = [1, 1]} : vector<8x32xf32> to vector<8x8xf32>
    %53 = vector.extract_strided_slice %5 {offsets = [0, 16], sizes = [8, 8], strides = [1, 1]} : vector<8x32xf32> to vector<8x8xf32>
    %54 = arith.mulf %52, %8 : vector<8x8xf32>
    %c4_i32_44 = arith.constant 4 : i32
    %55 = tpu.dynamic_rotate %52 by %c4_i32_44 dim 1 : vector<8x8xf32>, i32 -> vector<8x8xf32>
    %56 = arith.mulf %55, %9 : vector<8x8xf32>
    %57 = arith.addf %54, %56 : vector<8x8xf32>
    %c0_45 = arith.constant 0 : index
    %c2 = arith.constant 2 : index
    %c0_46 = arith.constant 0 : index
    %c0_47 = arith.constant 0 : index
    %58 = vector.load %arg11[%c0_45, %c2, %c0_46, %c0_47] : memref<1x4x8x8xf32, #tpu.memory_space<vmem>>, vector<1x1x8x8xf32>
    %59 = vector.shape_cast %58 : vector<1x1x8x8xf32> to vector<8x8xf32>
    %60 = vector.shape_cast %57 : vector<8x8xf32> to vector<1x1x8x8xf32>
    tpu.vector_store %arg11[%c0_45, %c2, %c0_46, %c0_47], %60 {strides = array<i32>} : memref<1x4x8x8xf32, #tpu.memory_space<vmem>>, vector<1x1x8x8xf32>,
    %61 = arith.mulf %53, %10 : vector<8x8xf32>
    %c4_i32_48 = arith.constant 4 : i32
    %62 = tpu.dynamic_rotate %53 by %c4_i32_48 dim 1 : vector<8x8xf32>, i32 -> vector<8x8xf32>
    %63 = arith.mulf %62, %11 : vector<8x8xf32>
    %64 = arith.addf %61, %63 : vector<8x8xf32>
    %c0_49 = arith.constant 0 : index
    %c2_50 = arith.constant 2 : index
    %c0_51 = arith.constant 0 : index
    %c0_52 = arith.constant 0 : index
    %65 = vector.load %arg12[%c0_49, %c2_50, %c0_51, %c0_52] : memref<1x4x8x8xf32, #tpu.memory_space<vmem>>, vector<1x1x8x8xf32>
    %66 = vector.shape_cast %65 : vector<1x1x8x8xf32> to vector<8x8xf32>
    %67 = vector.shape_cast %64 : vector<8x8xf32> to vector<1x1x8x8xf32>
    tpu.vector_store %arg12[%c0_49, %c2_50, %c0_51, %c0_52], %67 {strides = array<i32>} : memref<1x4x8x8xf32, #tpu.memory_space<vmem>>, vector<1x1x8x8xf32>,
    %68 = vector.extract_strided_slice %7 {offsets = [0, 16], sizes = [8, 8], strides = [1, 1]} : vector<8x32xf32> to vector<8x8xf32>
    %c0_53 = arith.constant 0 : index
    %c2_54 = arith.constant 2 : index
    %c0_55 = arith.constant 0 : index
    %c0_56 = arith.constant 0 : index
    %69 = vector.load %arg13[%c0_53, %c2_54, %c0_55, %c0_56] : memref<1x4x8x8xf32, #tpu.memory_space<vmem>>, vector<1x1x8x8xf32>
    %70 = vector.shape_cast %69 : vector<1x1x8x8xf32> to vector<8x8xf32>
    %71 = vector.shape_cast %68 : vector<8x8xf32> to vector<1x1x8x8xf32>
    tpu.vector_store %arg13[%c0_53, %c2_54, %c0_55, %c0_56], %71 {strides = array<i32>} : memref<1x4x8x8xf32, #tpu.memory_space<vmem>>, vector<1x1x8x8xf32>,
    %72 = vector.extract_strided_slice %3 {offsets = [0, 24], sizes = [8, 8], strides = [1, 1]} : vector<8x32xf32> to vector<8x8xf32>
    %73 = vector.extract_strided_slice %5 {offsets = [0, 24], sizes = [8, 8], strides = [1, 1]} : vector<8x32xf32> to vector<8x8xf32>
    %74 = arith.mulf %72, %8 : vector<8x8xf32>
    %c4_i32_57 = arith.constant 4 : i32
    %75 = tpu.dynamic_rotate %72 by %c4_i32_57 dim 1 : vector<8x8xf32>, i32 -> vector<8x8xf32>
    %76 = arith.mulf %75, %9 : vector<8x8xf32>
    %77 = arith.addf %74, %76 : vector<8x8xf32>
    %c0_58 = arith.constant 0 : index
    %c3 = arith.constant 3 : index
    %c0_59 = arith.constant 0 : index
    %c0_60 = arith.constant 0 : index
    %78 = vector.load %arg11[%c0_58, %c3, %c0_59, %c0_60] : memref<1x4x8x8xf32, #tpu.memory_space<vmem>>, vector<1x1x8x8xf32>
    %79 = vector.shape_cast %78 : vector<1x1x8x8xf32> to vector<8x8xf32>
    %80 = vector.shape_cast %77 : vector<8x8xf32> to vector<1x1x8x8xf32>
    tpu.vector_store %arg11[%c0_58, %c3, %c0_59, %c0_60], %80 {strides = array<i32>} : memref<1x4x8x8xf32, #tpu.memory_space<vmem>>, vector<1x1x8x8xf32>,
    %81 = arith.mulf %73, %10 : vector<8x8xf32>
    %c4_i32_61 = arith.constant 4 : i32
    %82 = tpu.dynamic_rotate %73 by %c4_i32_61 dim 1 : vector<8x8xf32>, i32 -> vector<8x8xf32>
    %83 = arith.mulf %82, %11 : vector<8x8xf32>
    %84 = arith.addf %81, %83 : vector<8x8xf32>
    %c0_62 = arith.constant 0 : index
    %c3_63 = arith.constant 3 : index
    %c0_64 = arith.constant 0 : index
    %c0_65 = arith.constant 0 : index
    %85 = vector.load %arg12[%c0_62, %c3_63, %c0_64, %c0_65] : memref<1x4x8x8xf32, #tpu.memory_space<vmem>>, vector<1x1x8x8xf32>
    %86 = vector.shape_cast %85 : vector<1x1x8x8xf32> to vector<8x8xf32>
    %87 = vector.shape_cast %84 : vector<8x8xf32> to vector<1x1x8x8xf32>
    tpu.vector_store %arg12[%c0_62, %c3_63, %c0_64, %c0_65], %87 {strides = array<i32>} : memref<1x4x8x8xf32, #tpu.memory_space<vmem>>, vector<1x1x8x8xf32>,
    %88 = vector.extract_strided_slice %7 {offsets = [0, 24], sizes = [8, 8], strides = [1, 1]} : vector<8x32xf32> to vector<8x8xf32>
    %c0_66 = arith.constant 0 : index
    %c3_67 = arith.constant 3 : index
    %c0_68 = arith.constant 0 : index
    %c0_69 = arith.constant 0 : index
    %89 = vector.load %arg13[%c0_66, %c3_67, %c0_68, %c0_69] : memref<1x4x8x8xf32, #tpu.memory_space<vmem>>, vector<1x1x8x8xf32>
    %90 = vector.shape_cast %89 : vector<1x1x8x8xf32> to vector<8x8xf32>
    %91 = vector.shape_cast %88 : vector<8x8xf32> to vector<1x1x8x8xf32>
    tpu.vector_store %arg13[%c0_66, %c3_67, %c0_68, %c0_69], %91 {strides = array<i32>} : memref<1x4x8x8xf32, #tpu.memory_space<vmem>>, vector<1x1x8x8xf32>,
    return
  }
  func.func @transform_0(%arg0: i32, %arg1: i32, %arg2: i32) -> (i32, i32, i32) {
    %c0_i32 = arith.constant 0 : i32
    %c0_i32_0 = arith.constant 0 : i32
    return %arg0, %arg2, %c0_i32 : i32, i32, i32
  }
  func.func @transform_1(%arg0: i32, %arg1: i32, %arg2: i32) -> (i32, i32) {
    %c0_i32 = arith.constant 0 : i32
    %c0_i32_0 = arith.constant 0 : i32
    return %c0_i32, %arg1 : i32, i32
  }
  func.func @transform_2(%arg0: i32, %arg1: i32, %arg2: i32) -> (i32, i32) {
    %c0_i32 = arith.constant 0 : i32
    %c0_i32_0 = arith.constant 0 : i32
    return %c0_i32, %arg1 : i32, i32
  }
  func.func @transform_3(%arg0: i32, %arg1: i32, %arg2: i32) -> (i32, i32) {
    %c0_i32 = arith.constant 0 : i32
    %c0_i32_0 = arith.constant 0 : i32
    return %c0_i32, %arg1 : i32, i32
  }
  func.func @transform_4(%arg0: i32, %arg1: i32, %arg2: i32) -> (i32, i32) {
    %c0_i32 = arith.constant 0 : i32
    %c0_i32_0 = arith.constant 0 : i32
    return %arg2, %c0_i32 : i32, i32
  }
  func.func @transform_5(%arg0: i32, %arg1: i32, %arg2: i32) -> (i32, i32) {
    %c0_i32 = arith.constant 0 : i32
    %c0_i32_0 = arith.constant 0 : i32
    return %arg2, %c0_i32 : i32, i32
  }
  func.func @transform_6(%arg0: i32, %arg1: i32, %arg2: i32) -> (i32, i32) {
    %c0_i32 = arith.constant 0 : i32
    %c0_i32_0 = arith.constant 0 : i32
    return %arg2, %c0_i32 : i32, i32
  }
  func.func @transform_7(%arg0: i32, %arg1: i32, %arg2: i32) -> (i32, i32) {
    %c0_i32 = arith.constant 0 : i32
    %c0_i32_0 = arith.constant 0 : i32
    return %arg2, %c0_i32 : i32, i32
  }
  func.func @transform_8(%arg0: i32, %arg1: i32, %arg2: i32) -> (i32, i32, i32, i32) {
    %c0_i32 = arith.constant 0 : i32
    %c0_i32_0 = arith.constant 0 : i32
    return %arg0, %arg1, %arg2, %c0_i32 : i32, i32, i32, i32
  }
  func.func @transform_9(%arg0: i32, %arg1: i32, %arg2: i32) -> (i32, i32, i32, i32) {
    %c0_i32 = arith.constant 0 : i32
    %c0_i32_0 = arith.constant 0 : i32
    return %arg0, %arg1, %arg2, %c0_i32 : i32, i32, i32, i32
  }
  func.func @transform_10(%arg0: i32, %arg1: i32, %arg2: i32) -> (i32, i32, i32, i32) {
    %c0_i32 = arith.constant 0 : i32
    %c0_i32_0 = arith.constant 0 : i32
    return %arg0, %arg1, %arg2, %c0_i32 : i32, i32, i32, i32
  }
}

</mosaic_0001>

<bundles_post_ra>
// kernel: tpu_custom_call.1
= control target key start
LH: loop header
LB: loop body
LE: loop exit
PB: predicated region body
PF: predicated region fallthrough
CT: control target
= control target key end

     0   :  { %s1948_s0 = inlined_call_operand.vmem [shape: f32[2,16,32], index: 0, kind: input, shape index: {}]   ;;  %s1949_s1 = inlined_call_operand.hbm [shape: f32[32,32], index: 1, kind: input, shape index: {}]   ;;  %s1950_s2 = inlined_call_operand.hbm [shape: f32[32,32], index: 2, kind: input, shape index: {}]   ;;  %s1951_s3 = inlined_call_operand.hbm [shape: f32[32,32], index: 3, kind: input, shape index: {}]   ;;  %s1952_s4 = inlined_call_operand.vmem [shape: f32[16,8], index: 4, kind: input, shape index: {}]   ;;  %s1953_s5 = inlined_call_operand.vmem [shape: f32[16,8], index: 5, kind: input, shape index: {}]   ;;  %s1954_s6 = inlined_call_operand.vmem [shape: f32[16,8], index: 6, kind: input, shape index: {}]   ;;  %s1955_s7 = inlined_call_operand.vmem [shape: f32[16,8], index: 7, kind: input, shape index: {}]   ;;  %s1956_s8 = inlined_call_operand.vmem [shape: f32[2,4,16,8], index: 8, kind: output, shape index: {0}]   ;;  %s1957_s9 = inlined_call_operand.vmem [shape: f32[2,4,16,8], index: 9, kind: output, shape index: {1}]   ;;  %s1958_s10 = inlined_call_operand.vmem [shape: f32[2,4,16,8], index: 10, kind: output, shape index: {2}]  }
   0x1   :  { %1965 = sst [smem:[#allocation19_spill]] %s1950_s2 }
   0x2   :  { %16 = vsyncpa [#allocation3], 0 }
   0x3   :  { %17 = vsyncpa [#allocation5], 0  ;;  %s1608_s13 = smov 0   ;;  %s1610_s14 = smov 0  }
   0x4   :  { %s1612_s15 = smov 0   ;;  %s1614_s16 = smov 0  }
   0x5   :  { %s1616_s17 = smov 0   ;;  %s1618_s18 = smov 0  }
   0x6   :  { %s1620_s19 = smov 0  }
   0x7 LB: > { %1966 = sst [smem:[#allocation12_spill]] %s1516_s14  ;;  %s1242_s20 = sadd.s32 4294967295, %s1536_s19   ;;  %s1536_s19 = sphi %s1620_s19, %s23_s19   ;;  %s1532_s18 = sphi %s1618_s18, %s1984_s18   ;;  %s1528_s17 = sphi %s1616_s17, %s1983_s17   ;;  %s1524_s16 = sphi %s1614_s16, %s1982_s16   ;;  %s1520_s15 = sphi %s1612_s15, %s1981_s15   ;;  %s1516_s14 = sphi %s1610_s14, %s1980_s14   ;;  %s1512_s13 = sphi %s1608_s13, %s1979_s13  }
   0x8   : > { %1967 = sst [smem:[#allocation13_spill]] %s1528_s17  ;;  %s35_s21 = sadd.s32 1, %s1528_s17 }
   0x9   : > { %1968 = sst [smem:[#allocation14_spill]] %s1532_s18  ;;  %p36_p0 = scmp.ge.s32.totalorder %s35_s21, 2 }
   0xa   : > { %1969 = sst [smem:[#allocation15_spill]] %s1536_s19  ;;  %s42_s22 = sadd.s32 1, %s1532_s18 }
   0xb   : > { %s263_s23 = sadd.s32 1, %s1516_s14  ;;  %p273_p1 = scmp.ne.s32.totalorder %s1516_s14, %s1512_s13 }
   0xc   : > { %s1986_s21 = smov (%p36_p0, %s35_s21), 0  ;;  %s1988_s22 = smov (!%p36_p0, %s42_s22), %s1532_s18 }
   0xd   : > { %1970 = sst [smem:[#allocation16_spill]] %s1986_s21  ;;  %s259_s24 = ssub.s32 %s1528_s17, %s1986_s21 }
   0xe   : > { %p274_p2 = scmp.eq.s32.totalorder %s1242_s20, 3  ;;  %p44_p3 = scmp.ge.s32.totalorder %s1988_s22, 2 }
   0xf   : > { %p1244_p4 = scmp.ge.s32.totalorder %s1536_s19, 1  ;;  %p347_p6 = scmp.lt.s32.totalorder %s1536_s19, 5 }
  0x10   : > { %p1655_p5 = por %p274_p2, %p273_p1  ;;  %s1990_s22 = smov (%p44_p3, %s1988_s22), 0 }
  0x11   : > { %1972 = sst [smem:[#allocation17_spill]] %s1990_s22  ;;  %p1662_p7 = pnand %p1244_p4, %p347_p6 }
  0x12   : > { %s256_s27 = ssub.s32 %s1532_s18, %s1990_s22  ;;  %p1668_p8 = scmp.eq.s32.totalorder %s1242_s20, 0 }
  0x13   : > { %s260_s29 = sor.u32 %s259_s24, %s256_s27  ;;  %p1297_p9 = pneg %p1662_p7 }
  0x14   : > { %p261_p10 = scmp.eq.s32.totalorder %s260_s29, 0  ;;  %s1977_s2 = sld [smem:[#allocation19_spill]] }
  0x15   : > { %p1676_p11 = pnand %p1668_p8, %p1297_p9  ;;  %s1538_s21 = smov [#allocation4]  }
  0x16   : > { %s1681_s11 = scalar_select %p261_p10, %s1516_s14, %s263_s23  }
  0x17   : > { %s378_s18 = sshll.u32 %s1538_s21, 4  ;;  %s1539_s24 = smov 128   ;;  %s379_s18 = int_to_ptr.vmem [resolvable:$true] %s378_s18 }
  0x18   : > { %1976 = sst [smem:[#allocation18_spill]] %s1681_s11  ;;  %s1540_s27 = smov 8  }
  0x19   : > { %s360_s19 = sshll.u32 %s1949_s1, 4  ;;  %s1541_s23 = smov [#allocation2]   ;;  %s361_s19 = int_to_ptr.hbm [resolvable:$true] %s360_s19 }
  0x1a   : > { %s376_s20 = sshll.u32 %s1977_s2, 4  ;;  %s362_s11 = sshll.u32 %s1541_s23, 4  ;;  %s377_s20 = int_to_ptr.hbm [resolvable:$true] %s376_s20  ;;  %s363_s11 = int_to_ptr.vmem [resolvable:$true] %s362_s11 }
  0x1b   : > { %1303 = dma.hbm_to_vmem [thread:$0]  (!%p1676_p11), %s377_s20, 512, %s379_s18, [#allocation5], %s1539_s24, %s1539_s24, %s1540_s27  }
  0x1c   : > { %s392_s12 = sshll.u32 %s1951_s3, 4  ;;  %s1542_s21 = smov [#allocation6]   ;;  %s393_s12 = int_to_ptr.hbm [resolvable:$true] %s392_s12 }
  0x1d   : > { %1300 = dma.hbm_to_vmem [thread:$0]  (!%p1676_p11), %s361_s19, 512, %s363_s11, [#allocation3], %s1539_s24, %s1539_s24, %s1540_s27  }
  0x1e   : > { %s394_s2 = sshll.u32 %s1542_s21, 4  ;;  %449 = sbr.rel (%p1662_p7) target bundleno = 812 (0x32c), region = 52  ;;  %s395_s2 = int_to_ptr.vmem [resolvable:$true] %s394_s2 }
  0x1f   : > { %1306 = dma.hbm_to_vmem [thread:$0]  (!%p1676_p11), %s393_s12, 512, %s395_s2, [#allocation5], %s1539_s24, %s1539_s24, %s1540_s27  }
  0x23   : > { %1503 = dma.done.wait (%p1668_p8), [#allocation3], 512  }
  0x24   : > { %1505 = vsyncadd (%p1668_p8), [#allocation3], 4294966784 }
  0x25   : > { %1507 = dma.done.wait (%p1668_p8), [#allocation5], 1024  }
  0x26   : > { %1509 = vsyncadd (%p1668_p8), [#allocation5], 4294966272  ;;  %p524_p12 = scmp.lt.s32.totalorder %s1524_s16, 1  ;;  %p526_p13 = scmp.lt.s32.totalorder %s1520_s15, 1  ;;  %v555_v0 = vld [vmem:[#allocation2 + $0x18] sm:$0xff]  ;;  %v554_v1 = vld [vmem:[#allocation2 + $0x10] sm:$0xff] }
  0x27   : > { %572 = vmatpush.msra.mxu0 %v555_v0  ;;  %v583_v2 = vld [vmem:[#allocation4 + $0x18] sm:$0xff]  ;;  %v553_v3 = vld [vmem:[#allocation2 + $0x8] sm:$0xff]  ;;  %v582_v4 = vld [vmem:[#allocation4 + $0x10] sm:$0xff]  ;;  %vm556_vm0 = vcmask 261120   ;;  %s1543_s11 = smov 104   ;;  %s1544_s20 = smov 112  }
  0x28   : > { %s525_s2 = scalar_select %p524_p12, %s1524_s16, 1  ;;  %596 = vmatpush.msra.mxu1 %v583_v2  ;;  %v581_v5 = vld [vmem:[#allocation4 + $0x8] sm:$0xff]  ;;  %v552_v6 = vld [vmem:[#allocation2] sm:$0xff]  ;;  %vm633_vm1 = vcmask 1047616   ;;  %v607_v37 = vld [vmem:[#allocation6 + $0x18] sm:$0xff]  ;;  %vm650_vm2 = vcmask 64512  }
  0x29   : > { %s1712_s14 = scalar_select %p526_p13, %s1520_s15, 1  ;;  %573 = vmatpush.msra.mxu0 %v554_v1  ;;  %v580_v8 = vld [vmem:[#allocation4] sm:$0xff]  ;;  %v606_v38 = vld [vmem:[#allocation6 + $0x10] sm:$0xff]  ;;  %620 = vmatpush.msra.mxu2 %v607_v37  ;;  %v605_v39 = vld [vmem:[#allocation6 + $0x8] sm:$0xff] }
  0x2a   : > { %s1256_s17 = sshll.u32 %s525_s2, 1  ;;  %597 = vmatpush.msra.mxu1 %v582_v4  ;;  %s1545_s24 = smov 120   ;;  %v604_v40 = vld [vmem:[#allocation6] sm:$0xff] }
  0x2b   : > { %s529_s18 = sadd.s32 %s1256_s17, %s1712_s14  ;;  %574 = vmatpush.msra.mxu0 %v553_v3  ;;  %s1546_s27 = smov 8   ;;  %621 = vmatpush.msra.mxu2 %v606_v38 }
  0x2c   : > { %s1257_s19 = sshll.u32 %s529_s18, 3  ;;  %598 = vmatpush.msra.mxu1 %v581_v5  ;;  %s1258_s29 = sshll.u32 %s1712_s14, 3 }
  0x2d   : > { %s531_s30 = scalar_lea.vmem %s1948_s0, %s1257_s19  ;;  %575 = vmatpush.msra.mxu0 %v552_v6  ;;  %s539_s12 = scalar_lea.vmem %s1953_s5, %s1258_s29  ;;  %622 = vmatpush.msra.mxu2 %v605_v39 }
  0x2e   : > { %v1718_v7 = vld [vmem:[%s531_s30] sm:$0xff]  ;;  %599 = vmatpush.msra.mxu1 %v580_v8  ;;  %s1547_s21 = smov 4   ;;  %s547_s17 = scalar_lea.vmem %s1955_s7, %s1258_s29 }
  0x2f   : > { %1262 = vmatmul.msk.f32.vlgmr.msra.gmra.mxu0 %vm556_vm0, %v1718_v7  ;;  %1263 = vmatmul.msk.f32.vlgmr.msra.gmra.mxu1 %vm556_vm0, %v1718_v7  ;;  %v629_v27 = vld [vmem:[%s539_s12] sm:$0xff]  ;;  %s543_s26 = scalar_lea.vmem %s1954_s6, %s1258_s29  ;;  %s535_s23 = scalar_lea.vmem %s1952_s4, %s1258_s29 }
  0x30   : > { %v631_v32 = vld [vmem:[%s547_s17] sm:$0xff]  ;;  %s1548_s22 = smov 16   ;;  %s1549_s12 = smov 24   ;;  %623 = vmatpush.msra.mxu2 %v604_v40 }
  0x31   : > { %v1804_v35 = vld [vmem:[%s543_s26] sm:$0xff]  ;;  %1264 = vmatmul.msk.f32.vlgmr.msra.gmra.mxu2 %vm556_vm0, %v1718_v7  ;;  %s1551_s29 = smov 20   ;;  %s1552_s2 = smov 124  }
  0x32   : > { %v1811_v36 = vld [vmem:[%s535_s23] sm:$0xff]  ;;  %s509_s14 = sand.u32 1, %s1512_s13  }
  0x33   : > { %s1840_s17 = sshll.u32 %s509_s14, 5 }
  0x34   : > { %s1861_s13 = scalar_lea.vmem [#allocation7], %s1840_s17 }
  0xac   : > { %v1724_v9 = vpop.f32.mrf.mxu0  ;;  %v1732_v10 = vpop.f32.mrf.mxu1 }
  0xad   : > { %790 = vrot.lane.b32.xlu2 %v1724_v9, %s1543_s11  ;;  %735 = vrot.lane.b32.xlu1 %v1724_v9, %s1544_s20 }
  0xae   : > { %677 = vrot.lane.b32.xlu0 %v1724_v9, %s1545_s24 }
  0xb4   : > { %v625_v4 = vpop.f32.mrf.mxu2 }
  0xb5   : > { %815 = vrot.lane.b32.xlu2 %v1732_v10, %s1543_s11  ;;  %760 = vrot.lane.b32.xlu1 %v1732_v10, %s1544_s20 }
  0xb6   : > { %704 = vrot.lane.b32.xlu0 %v1732_v10, %s1545_s24 }
 0x107   : > { %v1740_v11 = vpop.permute.xlu2 %790 }
 0x10f   : > { %v1750_v14 = vpop.permute.xlu2 %815 }
 0x11f   : > { %v1742_v12 = vpop.permute.xlu1 %735 }
 0x120   : > { %v1744_v13 = vpop.permute.xlu0 %677  ;;  %738 = vrot.lane.b32.xlu2 %v1742_v12, %s1546_s27 }
 0x121   : > { %680 = vrot.lane.b32.xlu0 %v1744_v13, %s1546_s27 }
 0x127   : > { %v1752_v15 = vpop.permute.xlu1 %760 }
 0x128   : > { %v1754_v16 = vpop.permute.xlu0 %704  ;;  %818 = vrot.lane.b32.xlu2 %v1750_v14, %s1546_s27 }
 0x129   : > { %763 = vrot.lane.b32.xlu0 %v1752_v15, %s1546_s27  ;;  %707 = vrot.lane.b32.xlu1 %v1754_v16, %s1546_s27 }
 0x131   : > { %634 = vrot.lane.b32.xlu0 %v1724_v9, %s1546_s27  ;;  %793 = vrot.lane.b32.xlu1 %v1740_v11, %s1546_s27 }
 0x139   : > { %653 = vrot.lane.b32.xlu1 %v1732_v10, %s1546_s27 }
 0x17a   : > { %v739_v17 = vpop.permute.xlu2 %738 }
 0x17b   : > { %v740_v18 = vsel %vm633_vm1, %v739_v17, %v1742_v12 }
 0x17c   : > { %741 = vrot.lane.b32.xlu1 %v740_v18, %s1546_s27 }
 0x182   : > { %v819_v19 = vpop.permute.xlu2 %818 }
 0x183   : > { %v820_v20 = vsel %vm633_vm1, %v819_v19, %v1750_v14 }
 0x184   : > { %821 = vrot.lane.b32.xlu1 %v820_v20, %s1546_s27 }
 0x193   : > { %v681_v21 = vpop.permute.xlu0 %680 }
 0x194   : > { %v682_v22 = vsel %vm633_vm1, %v681_v21, %v1744_v13 }
 0x195   : > { %683 = vrot.lane.b32.xlu2 %v682_v22, %s1546_s27  ;;  %v632_v22 = vmul.f32 %v1811_v36, %v1724_v9 }
 0x19b   : > { %v708_v23 = vpop.permute.xlu1 %707  ;;  %v764_v24 = vpop.permute.xlu0 %763 }
 0x19c   : > { %v709_v25 = vsel %vm633_vm1, %v708_v23, %v1754_v16  ;;  %v765_v26 = vsel %vm633_vm1, %v764_v24, %v1752_v15 }
 0x19d   : > { %710 = vrot.lane.b32.xlu0 %v709_v25, %s1546_s27  ;;  %766 = vrot.lane.b32.xlu2 %v765_v26, %s1546_s27 }
 0x1a3   : > { %v794_v28 = vpop.permute.xlu1 %793  ;;  %v635_v29 = vpop.permute.xlu0 %634 }
 0x1a4   : > { %v795_v30 = vsel %vm633_vm1, %v794_v28, %v1740_v11  ;;  %v636_v31 = vsel %vm633_vm1, %v635_v29, %v1724_v9 }
 0x1a5   : > { %796 = vrot.lane.b32.xlu0 %v795_v30, %s1546_s27  ;;  %641 = vrot.lane.b32.xlu2 %v629_v27, %s1547_s21 }
 0x1a6   : > { %637 = vrot.lane.b32.xlu1 %v636_v31, %s1546_s27  ;;  %v652_v31 = vmul.f32 %v1804_v35, %v1732_v10 }
 0x1ab   : > { %v654_v33 = vpop.permute.xlu1 %653 }
 0x1ac   : > { %v655_v34 = vsel %vm633_vm1, %v654_v33, %v1732_v10 }
 0x1ad   : > { %660 = vrot.lane.b32.xlu0 %v631_v32, %s1547_s21  ;;  %656 = vrot.lane.b32.xlu2 %v655_v34, %s1546_s27 }
 0x1ae   : > { %699 = vrot.lane.b32.xlu1 %v1804_v35, %s1546_s27 }
 0x1b5   : > { %672 = vrot.lane.b32.xlu0 %v1811_v36, %s1546_s27  ;;  %731 = vrot.lane.b32.xlu2 %v1811_v36, %s1548_s22  ;;  %s1550_s27 = smov 12  }
 0x1b6   : > { %786 = vrot.lane.b32.xlu1 %v1811_v36, %s1549_s12 }
 0x1bd   : > { %756 = vrot.lane.b32.xlu0 %v1804_v35, %s1548_s22  ;;  %811 = vrot.lane.b32.xlu2 %v1804_v35, %s1549_s12 }
 0x1ee   : > { %v742_v43 = vpop.permute.xlu1 %741 }
 0x1ef   : > { %v684_v41 = vpop.permute.xlu2 %683  ;;  %v743_v44 = vsel %vm633_vm1, %v742_v43, %v1742_v12 }
 0x1f0   : > { %v685_v45 = vsel %vm633_vm1, %v684_v41, %v1744_v13 }
 0x1f6   : > { %v822_v51 = vpop.permute.xlu1 %821 }
 0x1f7   : > { %v767_v42 = vpop.permute.xlu2 %766  ;;  %v823_v52 = vsel %vm633_vm1, %v822_v51, %v1750_v14 }
 0x1f8   : > { %v768_v53 = vsel %vm633_vm1, %v767_v42, %v1752_v15 }
 0x1ff   : > { %v642_v46 = vpop.permute.xlu2 %641 }
 0x200   : > { %v744_v47 = vmul.f32 %v743_v44, %v642_v46  ;;  %v686_v48 = vmul.f32 %v685_v45, %v642_v46 }
 0x202   : > { %746 = vrot.lane.b32.xlu2 %v744_v47, %s1550_s27  ;;  %688 = vrot.lane.b32.xlu0 %v686_v48, %s1547_s21 }
 0x207   : > { %v657_v0 = vpop.permute.xlu2 %656 }
 0x208   : > { %v658_v1 = vsel %vm633_vm1, %v657_v0, %v1732_v10 }
 0x20f   : > { %v711_v49 = vpop.permute.xlu0 %710  ;;  %v732_v5 = vpop.permute.xlu2 %731 }
 0x210   : > { %v712_v54 = vsel %vm633_vm1, %v711_v49, %v1754_v16  ;;  %v734_v14 = vmul.f32 %v732_v5, %v1724_v9 }
 0x217   : > { %v797_v50 = vpop.permute.xlu0 %796  ;;  %v812_v7 = vpop.permute.xlu2 %811 }
 0x218   : > { %v638_v59 = vpop.permute.xlu1 %637  ;;  %v798_v61 = vsel %vm633_vm1, %v797_v50, %v1740_v11  ;;  %v814_v30 = vmul.f32 %v812_v7, %v1732_v10 }
 0x219   : > { %v639_v60 = vsel %vm633_vm1, %v638_v59, %v1724_v9  ;;  %v799_v63 = vmul.f32 %v798_v61, %v642_v46 }
 0x21a   : > { %v644_v62 = vmul.f32 %v642_v46, %v639_v60 }
 0x21f   : > { %v661_v55 = vpop.permute.xlu0 %660 }
 0x220   : > { %v824_v56 = vmul.f32 %v823_v52, %v661_v55  ;;  %v769_v57 = vmul.f32 %v768_v53, %v661_v55  ;;  %v713_v58 = vmul.f32 %v712_v54, %v661_v55  ;;  %v663_v2 = vmul.f32 %v661_v55, %v658_v1  ;;  %v700_v16 = vpop.permute.xlu1 %699 }
 0x221   : > { %v702_v18 = vmul.f32 %v700_v16, %v1732_v10 }
 0x222   : > { %826 = vrot.lane.b32.xlu2 %v824_v56, %s1551_s29  ;;  %771 = vrot.lane.b32.xlu0 %v769_v57, %s1550_s27 }
 0x223   : > { %715 = vrot.lane.b32.xlu1 %v713_v58, %s1547_s21  ;;  %s1843_s21 = scalar_lea.vmem [#allocation9], %s1840_s17 }
 0x224   : > { %670 = vst.msk [vmem:[%s1843_s21] sm:$0xff] %vm650_vm2, %v625_v4 }
 0x227   : > { %v673_v3 = vpop.permute.xlu0 %672 }
 0x228   : > { %v675_v8 = vmul.f32 %v673_v3, %v1724_v9  ;;  %v787_v17 = vpop.permute.xlu1 %786 }
 0x229   : > { %v789_v23 = vmul.f32 %v787_v17, %v1724_v9 }
 0x22a   : > { %646 = vrot.lane.b32.xlu0 %v644_v62, %s1552_s2 }
 0x22b   : > { %801 = vrot.lane.b32.xlu1 %v799_v63, %s1551_s29 }
 0x22f   : > { %v757_v6 = vpop.permute.xlu0 %756 }
 0x230   : > { %v759_v24 = vmul.f32 %v757_v6, %v1732_v10 }
 0x233   : > { %665 = vrot.lane.b32.xlu1 %v663_v2, %s1552_s2 }
 0x23b   : > { %726 = vrot.lane.b32.xlu1 %v625_v4, %s1545_s24 }
 0x243   : > { %781 = vrot.lane.b32.xlu1 %v625_v4, %s1544_s20 }
 0x24b   : > { %836 = vrot.lane.b32.xlu1 %v625_v4, %s1543_s11 }
 0x25c   : > { %v747_v13 = vpop.permute.xlu2 %746 }
 0x25d   : > { %v749_v15 = vadd.f32 %v747_v13, %v734_v14 }
 0x274   : > { %v689_v11 = vpop.permute.xlu0 %688 }
 0x275   : > { %v691_v12 = vadd.f32 %v689_v11, %v675_v8 }
 0x277   : > { %693 = vrot.lane.b32.xlu2 %v691_v12, %s1545_s24 }
 0x27c   : > { %v827_v9 = vpop.permute.xlu2 %826 }
 0x27d   : > { %v829_v33 = vadd.f32 %v827_v9, %v814_v30 }
 0x27f   : > { %751 = vrot.lane.b32.xlu2 %v749_v15, %s1544_s20 }
 0x294   : > { %v772_v19 = vpop.permute.xlu0 %771 }
 0x295   : > { %v716_v20 = vpop.permute.xlu1 %715  ;;  %v774_v28 = vadd.f32 %v772_v19, %v759_v24 }
 0x296   : > { %v718_v21 = vadd.f32 %v716_v20, %v702_v18 }
 0x298   : > { %720 = vrot.lane.b32.xlu0 %v718_v21, %s1545_s24  ;;  %s1872_s24 = scalar_lea.vmem [#allocation8], %s1840_s17 }
 0x29c   : > { %v647_v25 = vpop.permute.xlu0 %646 }
 0x29d   : > { %v802_v26 = vpop.permute.xlu1 %801  ;;  %v649_v27 = vadd.f32 %v647_v25, %v632_v22 }
 0x29e   : > { %v804_v29 = vadd.f32 %v802_v26, %v789_v23 }
 0x29f   : > { %651 = vst.msk [vmem:[%s1861_s13] sm:$0xff] %vm650_vm2, %v649_v27 }
 0x2a0   : > { %806 = vrot.lane.b32.xlu2 %v804_v29, %s1543_s11  ;;  %776 = vrot.lane.b32.xlu0 %v774_v28, %s1544_s20 }
 0x2a5   : > { %v666_v32 = vpop.permute.xlu1 %665 }
 0x2a6   : > { %v668_v34 = vadd.f32 %v666_v32, %v652_v31  ;;  %v897_v43 = vld [vmem:[%s1861_s13] sm:$0xff] (%p1655_p5) }
 0x2a8   : > { %831 = vrot.lane.b32.xlu0 %v829_v33, %s1543_s11  ;;  %669 = vst.msk [vmem:[%s1872_s24] sm:$0xff] %vm650_vm2, %v668_v34  ;;  %s1277_s11 = sshll.u32 (%p1655_p5), %s1524_s16, 3 }
 0x2a9   : > { %s860_s20 = sadd.s32 (%p1655_p5), %s1520_s15, %s1277_s11 }
 0x2aa   : > { %s1278_s18 = sshll.u32 (%p1655_p5), %s860_s20, 3 }
 0x2ab   : > { %s862_s28 = scalar_lea.vmem (%p1655_p5), %s1956_s8, %s1278_s18 }
 0x2ac   : > { %898 = vst [vmem:[%s862_s28] sm:$0xff] (%p1655_p5), %v897_v43 }
 0x2ad   : > { %v727_v10 = vpop.permute.xlu1 %726 }
 0x2ae   : > { %1267 = vst.msk [vmem:[%s1843_s21 + $0x8] sm:$0xff] %vm650_vm2, %v727_v10 }
 0x2b5   : > { %v782_v35 = vpop.permute.xlu1 %781 }
 0x2b6   : > { %1270 = vst.msk [vmem:[%s1843_s21 + $0x10] sm:$0xff] %vm650_vm2, %v782_v35 }
 0x2bd   : > { %v837_v38 = vpop.permute.xlu1 %836 }
 0x2be   : > { %1273 = vst.msk [vmem:[%s1843_s21 + $0x18] sm:$0xff] %vm650_vm2, %v837_v38 }
 0x2d1   : > { %v694_v36 = vpop.permute.xlu2 %693 }
 0x2d2   : > { %1265 = vst.msk [vmem:[%s1861_s13 + $0x8] sm:$0xff] %vm650_vm2, %v694_v36 }
 0x2d9   : > { %v752_v37 = vpop.permute.xlu2 %751  ;;  %v899_v44 = vld [vmem:[%s1861_s13 + $0x8] sm:$0xff] (%p1655_p5) }
 0x2da   : > { %1268 = vst.msk [vmem:[%s1861_s13 + $0x10] sm:$0xff] %vm650_vm2, %v752_v37 }
 0x2db   : > { %900 = vst [vmem:[%s862_s28 + $0x10] sm:$0xff] (%p1655_p5), %v899_v44 }
 0x2e1   : > { %v901_v45 = vld [vmem:[%s1861_s13 + $0x10] sm:$0xff] (%p1655_p5) }
 0x2e2   : > { %902 = vst [vmem:[%s862_s28 + $0x20] sm:$0xff] (%p1655_p5), %v901_v45 }
 0x2fa   : > { %v807_v39 = vpop.permute.xlu2 %806 }
 0x2fb   : > { %1271 = vst.msk [vmem:[%s1861_s13 + $0x18] sm:$0xff] %vm650_vm2, %v807_v39 }
 0x302   : > { %v903_v46 = vld [vmem:[%s1861_s13 + $0x18] sm:$0xff] (%p1655_p5) }
 0x303   : > { %904 = vst [vmem:[%s862_s28 + $0x30] sm:$0xff] (%p1655_p5), %v903_v46 }
 0x30a   : > { %v721_v40 = vpop.permute.xlu0 %720 }
 0x30b   : > { %1266 = vst.msk [vmem:[%s1872_s24 + $0x8] sm:$0xff] %vm650_vm2, %v721_v40 }
 0x312   : > { %v777_v41 = vpop.permute.xlu0 %776 }
 0x313   : > { %1269 = vst.msk [vmem:[%s1872_s24 + $0x10] sm:$0xff] %vm650_vm2, %v777_v41 }
 0x317   : > { %855 = sbr.rel (!%p1655_p5) target bundleno = 796 (0x31c), region = 68 }
 0x31a   : > { %v832_v42 = vpop.permute.xlu0 %831 }
 0x31b   : > { %1272 = vst.msk [vmem:[%s1872_s24 + $0x18] sm:$0xff] %vm650_vm2, %v832_v42 }
 0x31c PF: > { %910 = sbr.rel (!%p1655_p5) target bundleno = 804 (0x324), region = 106  ;;  %s1279_s30 = sshll.u32 (%p1655_p5), %s1524_s16, 3  ;;  %v952_v47 = vld [vmem:[%s1872_s24] sm:$0xff] (%p1655_p5)  ;;  %v954_v48 = vld [vmem:[%s1872_s24 + $0x8] sm:$0xff] (%p1655_p5)  ;;  %v956_v49 = vld [vmem:[%s1872_s24 + $0x10] sm:$0xff] (%p1655_p5) }
 0x31d   : > { %s915_s23 = sadd.s32 (%p1655_p5), %s1520_s15, %s1279_s30 }
 0x31e   : > { %s1280_s22 = sshll.u32 (%p1655_p5), %s915_s23, 3 }
 0x31f   : > { %s917_s29 = scalar_lea.vmem (%p1655_p5), %s1957_s9, %s1280_s22 }
 0x320   : > { %953 = vst [vmem:[%s917_s29] sm:$0xff] (%p1655_p5), %v952_v47 }
 0x321   : > { %955 = vst [vmem:[%s917_s29 + $0x10] sm:$0xff] %v954_v48 }
 0x322   : > { %v958_v50 = vld [vmem:[%s1872_s24 + $0x18] sm:$0xff]  ;;  %957 = vst [vmem:[%s917_s29 + $0x20] sm:$0xff] %v956_v49 }
 0x323   : > { %959 = vst [vmem:[%s917_s29 + $0x30] sm:$0xff] %v958_v50 }
 0x324 PF: > { %965 = sbr.rel (!%p1655_p5) target bundleno = 812 (0x32c), region = 144  ;;  %s1281_s2 = sshll.u32 (%p1655_p5), %s1524_s16, 3  ;;  %v1007_v51 = vld [vmem:[%s1843_s21] sm:$0xff] (%p1655_p5)  ;;  %v1009_v52 = vld [vmem:[%s1843_s21 + $0x8] sm:$0xff] (%p1655_p5)  ;;  %v1011_v53 = vld [vmem:[%s1843_s21 + $0x10] sm:$0xff] (%p1655_p5) }
 0x325   : > { %s970_s14 = sadd.s32 (%p1655_p5), %s1520_s15, %s1281_s2  ;;  %v1013_v54 = vld [vmem:[%s1843_s21 + $0x18] sm:$0xff] (%p1655_p5) }
 0x326   : > { %s1282_s17 = sshll.u32 (%p1655_p5), %s970_s14, 3 }
 0x327   : > { %s972_s11 = scalar_lea.vmem (%p1655_p5), %s1958_s10, %s1282_s17 }
 0x328   : > { %1008 = vst [vmem:[%s972_s11] sm:$0xff] (%p1655_p5), %v1007_v51 }
 0x329   : > { %1010 = vst [vmem:[%s972_s11 + $0x10] sm:$0xff] %v1009_v52 }
 0x32a   : > { %1012 = vst [vmem:[%s972_s11 + $0x20] sm:$0xff] %v1011_v53 }
 0x32b   : > { %1014 = vst [vmem:[%s972_s11 + $0x30] sm:$0xff] %v1013_v54 }
 0x32c PF: > { %s1978_s25 = sld [smem:[#allocation15_spill]] }
 0x32d   : > { %s1979_s13 = sld [smem:[#allocation12_spill]] }
 0x32e   : > { %s1980_s14 = sld [smem:[#allocation18_spill]] }
 0x32f   : > { %s1981_s15 = sld [smem:[#allocation13_spill]] }
 0x330   : > { %s1982_s16 = sld [smem:[#allocation14_spill]] }
 0x331   : > { %s1983_s17 = sld [smem:[#allocation16_spill]] }
 0x332   : > { %s23_s19 = sadd.s32 1, %s1978_s25   ;;  %s1984_s18 = sld [smem:[#allocation17_spill]] }
 0x333   : > { %p20_p0 = scmp.ge.s32.totalorder %s23_s19, 6  }
 0x335   :  { %22 = sbr.rel (!%p20_p0) target bundleno = 7 (0x7), region = 257 }
 0x33a   :  { %1044 = vsyncpa [#allocation3], 1 }
 0x33b   :  { %1046 = vsyncpa [#allocation3 + $0x1], 1 }
 0x33c   :  { %1047 = vsyncpa [#allocation5], 1 }

</bundles_post_ra>
